<compile_context>
chip_gen: v5e
topology: v5e:2x2
jax: 0.10.0
libtpu: 0.0.40
codegen_flags: <defaults>
</compile_context>

<pallas_src>
import functools

import jax
import jax.numpy as jnp
from jax.experimental import pallas as pl
from jax.experimental.pallas import tpu as pltpu

_LANE = 128
_SUBLANE = 8


def _round_up(x, m):
    return ((x + m - 1) // m) * m


def _xent_kernel(q_ref, p_ref, o_ref, acc_ref, *,
                 n_rows, n_cols, tb, tc, acc_w, mask_rows, mask_cols):
    i = pl.program_id(0)           # batch-tile index  ("parallel" -> megacore sharding)
    j = pl.program_id(1)           # class-tile index  ("arbitrary" reduction)

    @pl.when(j == 0)
    def _():
        acc_ref[...] = jnp.zeros_like(acc_ref)

    # Rank-1 row-tail mask (tb, 1); statically elided when B % tb == 0.
    if mask_rows:
        row_ok = (jax.lax.broadcasted_iota(jnp.int32, (tb, 1), 0) + i * tb) < n_rows

    col_base = j * tc
    folded = None
    # Stream the tile one lane-dense 128-wide block at a time: no whole-tile f32 temps,
    # and exactly one accumulator read-modify-write per grid step.
    for k in range(tc // acc_w):
        sl = slice(k * acc_w, (k + 1) * acc_w)
        q = q_ref[:, sl].astype(jnp.float32)
        p = p_ref[:, sl].astype(jnp.float32)

        valid = p > 0.0                          # xlogy guard: p == 0 contributes exactly 0
        if mask_rows:
            valid = valid & row_ok
        if mask_cols:
            # Rank-1 col-tail mask (1, acc_w) for this lane block.
            col_ok = (jax.lax.broadcasted_iota(jnp.int32, (1, acc_w), 1)
                      + (col_base + k * acc_w)) < n_cols
            valid = valid & col_ok

        # TODO(synk): if a v7x profile with bf16 inputs shows the EUP slot saturating,
        # replace f32 log2 with exponent extraction + a short VPU polynomial.
        term = jnp.where(valid, p * jnp.log2(q), 0.0)        # (tb, acc_w)
        folded = term if folded is None else folded + term

    acc_ref[...] += folded

    @pl.when(j == pl.num_programs(1) - 1)
    def _():
        # One cross-sublane reduce per batch tile, only in the epilogue: (tb, acc_w) -> (1, acc_w).
        o_ref[...] = jnp.sum(acc_ref[...], axis=0, keepdims=True)[None]


def cross_entropy(q_pred, p_targ, *, tb=None, tc=None, vmem_limit_bytes=None):
    """Pallas equivalent of torch.mean(-torch.sum(P_targ * torch.log2(Q_pred), dim=1))."""
    assert q_pred.shape == p_targ.shape and q_pred.ndim == 2
    B, C = q_pred.shape

    # Per-generation scoped-VMEM budget (v7x: 64 MiB/TC vs 128 MiB on v5e/v6e).
    if vmem_limit_bytes is None:
        try:
            cap = getattr(pltpu.get_tpu_info(), "vmem_capacity_bytes", 64 * 1024 * 1024)
        except Exception:  # pragma: no cover - interpret mode / exotic backends
            cap = 64 * 1024 * 1024
        vmem_limit_bytes = int(cap * 0.5)

    # Class tiling: lane-dense (multiple of 128) blocks; when C % 128 != 0 pad tc up to the
    # next multiple of 128 (col mask covers the padding) so acc_w stays 128; cap at 1024.
    if tc is None:
        tc = min(_round_up(C, _LANE), 1024)
    acc_w = _LANE if tc % _LANE == 0 else tc

    # Batch tiling: largest tile whose pipelined input buffers + f32 accumulator fit ~60% of
    # the VMEM limit (2 inputs x 2 pipeline buffers x tb x tc x itemsize + tb x acc_w x 4).
    if tb is None:
        itemsize = max(jnp.dtype(q_pred.dtype).itemsize, jnp.dtype(p_targ.dtype).itemsize)
        budget = int(vmem_limit_bytes * 0.6)
        tb = budget // (4 * tc * itemsize + 4 * acc_w)
        tb = max(_SUBLANE, (tb // _SUBLANE) * _SUBLANE)
        tb = min(tb, 1024)
        # Keep >= 2 batch tiles whenever possible so the "parallel" axis feeds both v7x TCs.
        if B >= 2 * _SUBLANE:
            tb = min(tb, _round_up(pl.cdiv(B, 2), _SUBLANE))
    # Legality clamp: block rows must be a multiple of 8 not exceeding the array, or exactly B
    # when B < 8 (ragged last tile is handled by the row mask).
    if B < _SUBLANE:
        tb = B
    else:
        tb = max(_SUBLANE, min((tb // _SUBLANE) * _SUBLANE, (B // _SUBLANE) * _SUBLANE))

    nb = pl.cdiv(B, tb)
    nc = pl.cdiv(C, tc)

    kernel = functools.partial(
        _xent_kernel,
        n_rows=B, n_cols=C, tb=tb, tc=tc, acc_w=acc_w,
        mask_rows=(B % tb != 0), mask_cols=(C % tc != 0),
    )

    partials = pl.pallas_call(
        kernel,
        out_shape=jax.ShapeDtypeStruct((nb, 1, acc_w), jnp.float32),
        grid_spec=pltpu.PrefetchScalarGridSpec(
            num_scalar_prefetch=0,
            grid=(nb, nc),
            in_specs=[
                pl.BlockSpec((tb, tc), lambda i, j: (i, j)),
                pl.BlockSpec((tb, tc), lambda i, j: (i, j)),
            ],
            out_specs=pl.BlockSpec((1, 1, acc_w), lambda i, j: (i, 0, 0)),
            scratch_shapes=[pltpu.VMEM((tb, acc_w), jnp.float32)],
        ),
        compiler_params=pltpu.CompilerParams(
            # Batch tiles are independent (uses both TCs on v7x); class axis is the reduction.
            dimension_semantics=("parallel", "arbitrary"),
            vmem_limit_bytes=vmem_limit_bytes,
        ),
    )(q_pred, p_targ)

    # Final negation + mean over the batch (tiny, done in the wrapper).
    return -jnp.sum(partials) / B


if __name__ == "__main__":
    key = jax.random.PRNGKey(0)

    def ref_xent(q, p):
        qf = q.astype(jnp.float32)
        pf = p.astype(jnp.float32)
        return jnp.mean(-jnp.sum(pf * jnp.log2(qf), axis=1))

    k1, k2, k3, k4, k5, k6 = jax.random.split(key, 6)

    # Case 1: small lane-dense problem, auto tiling (tb capped so nb = 2 -> both v7x cores).
    B1, C1 = 16, 128
    q1 = jax.nn.softmax(jax.random.normal(k1, (B1, C1), jnp.float32), axis=1)
    p1 = jax.nn.softmax(jax.random.normal(k2, (B1, C1), jnp.float32), axis=1)
    out1 = jax.block_until_ready(cross_entropy(q1, p1))
    r1 = ref_xent(q1, p1)
    assert jnp.allclose(out1, r1, rtol=1e-5, atol=1e-5), (out1, r1)

    # Case 2: ragged batch + ragged multi-tile class axis with small forced tiles
    # (row mask, col mask, class-axis accumulation, parallel batch tiles).
    B2, C2 = 20, 300
    q2 = jax.nn.softmax(jax.random.normal(k3, (B2, C2), jnp.float32), axis=1)
    p2 = jax.nn.softmax(jax.random.normal(k4, (B2, C2), jnp.float32), axis=1)
    out2 = jax.block_until_ready(cross_entropy(q2, p2, tb=8, tc=128))
    r2 = ref_xent(q2, p2)
    assert jnp.allclose(out2, r2, rtol=1e-5, atol=1e-5), (out2, r2)

    # Case 3: bf16 inputs, C not a multiple of 128 (tc padded to 128 + col mask), auto tiling.
    B3, C3 = 12, 96
    q3 = jax.nn.softmax(jax.random.normal(k5, (B3, C3), jnp.float32), axis=1).astype(jnp.bfloat16)
    p3 = jax.nn.softmax(jax.random.normal(k6, (B3, C3), jnp.float32), axis=1).astype(jnp.bfloat16)
    out3 = jax.block_until_ready(cross_entropy(q3, p3))
    r3 = ref_xent(q3, p3)
    assert jnp.allclose(out3, r3, rtol=2e-3, atol=2e-3), (out3, r3)

    print("KERNEL_OK")
</pallas_src>

<mosaic_0001>
module attributes {stable_mosaic.version = 11 : i64} {
  func.func @_xent_kernel(%arg0: i32, %arg1: i32, %arg2: memref<8x128xf32, #tpu.memory_space<vmem>>, %arg3: memref<8x128xf32, #tpu.memory_space<vmem>>, %arg4: memref<1x1x128xf32, #tpu.memory_space<vmem>>, %arg5: memref<8x128xf32, #tpu.memory_space<vmem>>) attributes {dimension_semantics = [#tpu.dimension_semantics<parallel>, #tpu.dimension_semantics<arbitrary>], iteration_bounds = array<i64: 2, 1>, scalar_prefetch = 0 : i64, scratch_operands = 1 : i64, tpu.core_type = #tpu.core_type<tc>, window_params = [{transform_indices = @transform_0, window_bounds = array<i64: 8, 128>}, {transform_indices = @transform_1, window_bounds = array<i64: 8, 128>}, {transform_indices = @transform_2, window_bounds = array<i64: 1, 1, 128>}]} {
    %c0_i32 = arith.constant 0 : i32
    %0 = arith.cmpi eq, %arg1, %c0_i32 : i32
    %1 = arith.extui %0 : i1 to i32
    %c0_i32_0 = arith.constant 0 : i32
    %2 = arith.cmpi ne, %1, %c0_i32_0 : i32
    scf.if %2 {
      %cst_12 = arith.constant 0.000000e+00 : f32
      %20 = vector.broadcast %cst_12 : f32 to vector<8x128xf32>
      %c0_13 = arith.constant 0 : index
      %c0_14 = arith.constant 0 : index
      %21 = vector.load %arg5[%c0_13, %c0_14] : memref<8x128xf32, #tpu.memory_space<vmem>>, vector<8x128xf32>
      tpu.vector_store %arg5[%c0_13, %c0_14], %20 {strides = array<i32>} : memref<8x128xf32, #tpu.memory_space<vmem>>, vector<8x128xf32>,
    } else {
    }
    %c0 = arith.constant 0 : index
    %c0_1 = arith.constant 0 : index
    %3 = vector.load %arg2[%c0, %c0_1] : memref<8x128xf32, #tpu.memory_space<vmem>>, vector<8x128xf32>
    %c0_2 = arith.constant 0 : index
    %c0_3 = arith.constant 0 : index
    %4 = vector.load %arg3[%c0_2, %c0_3] : memref<8x128xf32, #tpu.memory_space<vmem>>, vector<8x128xf32>
    %cst = arith.constant 0.000000e+00 : f32
    %5 = vector.broadcast %cst : f32 to vector<8x128xf32>
    %6 = arith.cmpf ogt, %4, %5 : vector<8x128xf32>
    %7 = math.log %3 : vector<8x128xf32>
    %cst_4 = arith.constant 2.000000e+00 : f32
    %8 = math.log %cst_4 : f32
    %9 = vector.broadcast %8 : f32 to vector<8x128xf32>
    %10 = arith.divf %7, %9 : vector<8x128xf32>
    %11 = arith.mulf %4, %10 : vector<8x128xf32>
    %cst_5 = arith.constant 0.000000e+00 : f32
    %12 = vector.broadcast %cst_5 : f32 to vector<8x128xf32>
    %13 = arith.select %6, %11, %12 : vector<8x128xi1>, vector<8x128xf32>
    %c0_6 = arith.constant 0 : index
    %c0_7 = arith.constant 0 : index
    %14 = vector.load %arg5[%c0_6, %c0_7] : memref<8x128xf32, #tpu.memory_space<vmem>>, vector<8x128xf32>
    %15 = arith.addf %14, %13 : vector<8x128xf32>
    %c0_8 = arith.constant 0 : index
    %c0_9 = arith.constant 0 : index
    %16 = vector.load %arg5[%c0_8, %c0_9] : memref<8x128xf32, #tpu.memory_space<vmem>>, vector<8x128xf32>
    tpu.vector_store %arg5[%c0_8, %c0_9], %15 {strides = array<i32>} : memref<8x128xf32, #tpu.memory_space<vmem>>, vector<8x128xf32>,
    %c0_i32_10 = arith.constant 0 : i32
    %17 = arith.cmpi eq, %arg1, %c0_i32_10 : i32
    %18 = arith.extui %17 : i1 to i32
    %c0_i32_11 = arith.constant 0 : i32
    %19 = arith.cmpi ne, %18, %c0_i32_11 : i32
    scf.if %19 {
      %c0_12 = arith.constant 0 : index
      %c0_13 = arith.constant 0 : index
      %20 = vector.load %arg5[%c0_12, %c0_13] : memref<8x128xf32, #tpu.memory_space<vmem>>, vector<8x128xf32>
      %cst_14 = arith.constant dense<0.000000e+00> : vector<128xf32>
      %21 = vector.multi_reduction <add>, %20, %cst_14 [0] : vector<8x128xf32> to vector<128xf32>
      %22 = vector.shape_cast %21 : vector<128xf32> to vector<1x128xf32>
      %23 = vector.shape_cast %22 : vector<1x128xf32> to vector<1x1x128xf32>
      %c0_15 = arith.constant 0 : index
      %c0_16 = arith.constant 0 : index
      %c0_17 = arith.constant 0 : index
      %24 = vector.load %arg4[%c0_15, %c0_16, %c0_17] : memref<1x1x128xf32, #tpu.memory_space<vmem>>, vector<1x1x128xf32>
      tpu.vector_store %arg4[%c0_15, %c0_16, %c0_17], %23 {strides = array<i32>} : memref<1x1x128xf32, #tpu.memory_space<vmem>>, vector<1x1x128xf32>,
    } else {
    }
    return
  }
  func.func @transform_0(%arg0: i32, %arg1: i32) -> (i32, i32) {
    %c0_i32 = arith.constant 0 : i32
    return %arg0, %arg1 : i32, i32
  }
  func.func @transform_1(%arg0: i32, %arg1: i32) -> (i32, i32) {
    %c0_i32 = arith.constant 0 : i32
    return %arg0, %arg1 : i32, i32
  }
  func.func @transform_2(%arg0: i32, %arg1: i32) -> (i32, i32, i32) {
    %c0_i32 = arith.constant 0 : i32
    %c0_i32_0 = arith.constant 0 : i32
    %c0_i32_1 = arith.constant 0 : i32
    return %arg0, %c0_i32, %c0_i32_0 : i32, i32, i32
  }
}

</mosaic_0001>

<bundles_post_ra>
// kernel: tpu_custom_call.1
= control target key start
LH: loop header
LB: loop body
LE: loop exit
PB: predicated region body
PF: predicated region fallthrough
CT: control target
= control target key end

     0   :  { %7 = vsyncpa [#allocation4], 0  ;;  %s741_s0 = inlined_call_operand.hbm [shape: f32[16,128], index: 0, kind: input, shape index: {}]   ;;  %s742_s1 = inlined_call_operand.hbm [shape: f32[16,128], index: 1, kind: input, shape index: {}]   ;;  %s743_s2 = inlined_call_operand.hbm [shape: f32[2,1,128], index: 2, kind: output, shape index: {}]  }
   0x1   :  { %9 = vsyncpa [#allocation4 + $0x1], 0 }
   0x2   :  { %10 = vsyncpa [#allocation7], 0 }
   0x3   :  { %12 = vsyncpa [#allocation7 + $0x1], 0 }
   0x4   :  { %13 = vsyncpa [#allocation5], 0 }
   0x5   :  { %15 = vsyncpa [#allocation5 + $0x1], 0  ;;  %s612_s9 = smov 0   ;;  %s614_s10 = smov 0  }
   0x6   :  { %s616_s11 = smov 0   ;;  %s618_s12 = smov 0  }
   0x7   :  { %s620_s13 = smov 0   ;;  %s622_s14 = smov 0  }
   0x8 LB: > { %s363_s15 = sadd.s32 4294967295, %s594_s14   ;;  %s364_s16 = sadd.s32 4294967294, %s594_s14   ;;  %s594_s14 = sphi %s622_s14, %s21_s14   ;;  %s590_s13 = sphi %s620_s13, %s752_s13   ;;  %s586_s12 = sphi %s618_s12, %s751_s12   ;;  %s582_s11 = sphi %s616_s11, %s750_s11   ;;  %s578_s10 = sphi %s614_s10, %s749_s10   ;;  %s574_s9 = sphi %s612_s9, %s748_s9  }
   0x9   : > { %s33_s17 = sadd.s32 1, %s590_s13  ;;  %s42_s18 = sadd.s32 1, %s582_s11 }
   0xa   : > { %p35_p0 = scmp.ge.s32.totalorder %s33_s17, 2  ;;  %p49_p1 = scmp.ne.s32.totalorder %s582_s11, %s578_s10 }
   0xb   : > { %p50_p2 = scmp.eq.s32.totalorder %s594_s14, 0  ;;  %p55_p3 = scmp.ne.s32.totalorder %s578_s10, %s574_s9 }
   0xc   : > { %s754_s17 = smov (%p35_p0, %s33_s17), 0  ;;  %p56_p5 = scmp.eq.s32.totalorder %s363_s15, 0 }
   0xd   : > { %p653_p4 = por %p50_p2, %p49_p1  ;;  %s37_s20 = ssub.s32 %s590_s13, %s754_s17 }
   0xe   : > { %p107_p6 = scmp.eq.s32.totalorder %s363_s15, 1  ;;  %p40_p7 = scmp.eq.s32.totalorder %s37_s20, 0 }
   0xf   : > { %p659_p8 = por %p56_p5, %p55_p3  ;;  %p113_p10 = scmp.eq.s32.totalorder %s364_s16, 1 }
  0x10   : > { %p663_p9 = por %p107_p6, %p49_p1  ;;  %p366_p12 = scmp.ge.s32.totalorder %s594_s14, 2 }
  0x11   : > { %s668_s23 = scalar_select %p40_p7, %s582_s11, %s42_s18  }
  0x12   : > { %p670_p11 = por %p113_p10, %p55_p3  ;;  %p393_p13 = scmp.lt.s32.totalorder %s594_s14, 2 }
  0x13   : > { %s133_s25 = sand.u32 1, %s582_s11   ;;  %s368_s27 = sshll.u32 %s590_s13, 3 }
  0x14   : > { %s367_s26 = sshll.u32 %s133_s25, 3  ;;  %s142_s30 = scalar_lea.hbm %s741_s0, %s368_s27 }
  0x15   : > { %s137_s3 = scalar_lea.vmem [#allocation3], %s367_s26  ;;  %s144_s5 = sshll.u32 %s142_s30, 4  ;;  %s145_s5 = int_to_ptr.hbm [resolvable:$true] %s144_s5 }
  0x16   : > { %s146_s4 = sshll.u32 %s137_s3, 4  ;;  %p383_p0 = pnand %p393_p13, %p653_p4  ;;  %s147_s4 = int_to_ptr.vmem [resolvable:$true] %s146_s4 }
  0x17   : > { %p371_p1 = scmp.ge.s32.totalorder %s594_s14, 1  ;;  %p171_p2 = scmp.lt.s32.totalorder %s594_s14, 3 }
  0x18   : > { %s134_s6 = scalar_lea.sflag [#allocation4], %s133_s25  ;;  %s162_s15 = scalar_lea.hbm %s742_s1, %s368_s27 }
  0x19   : > { %385 = dma.hbm_to_vmem [thread:$0]  (!%p383_p0), %s145_s5, 128, %s147_s4, %s134_s6  }
  0x1a   : > { %p172_p3 = pnand %p371_p1, %p171_p2  ;;  %s157_s16 = scalar_lea.vmem [#allocation6], %s367_s26 }
  0x1b   : > { %s166_s18 = sshll.u32 %s157_s16, 4  ;;  %s164_s20 = sshll.u32 %s162_s15, 4  ;;  %s167_s18 = int_to_ptr.vmem [resolvable:$true] %s166_s18  ;;  %s165_s20 = int_to_ptr.hbm [resolvable:$true] %s164_s20 }
  0x1c   : > { %s154_s28 = scalar_lea.sflag [#allocation7], %s133_s25  ;;  %175 = sbr.rel (%p172_p3) target bundleno = 73 (0x49), region = 28 }
  0x1d   : > { %388 = dma.hbm_to_vmem [thread:$0]  (!%p383_p0), %s165_s20, 128, %s167_s18, %s154_s28  }
  0x1e   : > { %s689_s19 = sand.u32 (!%p172_p3), 1, %s578_s10  }
  0x1f   : > { %s372_s29 = sshll.u32 (!%p172_p3), %s689_s19, 3  ;;  %s178_s30 = scalar_lea.sflag (!%p172_p3), [#allocation4], %s689_s19 }
  0x20   : > { %s181_s3 = scalar_lea.vmem (!%p172_p3), [#allocation3], %s372_s29 }
  0x21   : > { %561 = dma.done.wait (%p659_p8), %s178_s30, 128  }
  0x22   : > { %563 = vsyncadd (%p659_p8), %s178_s30, 4294967168  ;;  %s188_s26 = scalar_lea.sflag [#allocation7], %s689_s19  ;;  %s191_s25 = scalar_lea.vmem [#allocation6], %s372_s29 }
  0x23   : > { %565 = dma.done.wait (%p659_p8), %s188_s26, 128  }
  0x24   : > { %567 = vsyncadd (%p659_p8), %s188_s26, 4294967168  ;;  %v596_v0 = vmov 0.6931472   ;;  %v222_v2 = vld [vmem:[%s181_s3] sm:$0xff]  ;;  %v223_v8 = vld [vmem:[%s191_s25] sm:$0xff]  ;;  %s260_s4 = scalar_lea.hbm %s743_s2, %s586_s12  ;;  %s216_s5 = scalar_lea.vmem [#allocation8], %s689_s19 }
  0x25   : > { %444 = vrcp.f32 %v596_v0  ;;  %vm224_vm1 = vcmp.gt.f32.partialorder %v223_v8, 0.0  ;;  %s262_s6 = sshll.u32 %s216_s5, 4  ;;  %s264_s7 = sshll.u32 %s260_s4, 4  ;;  %s263_s6 = int_to_ptr.vmem [resolvable:$true] %s262_s6  ;;  %s265_s7 = int_to_ptr.hbm [resolvable:$true] %s264_s7 }
  0x26   : > { %446 = vlog2.f32 %v222_v2  ;;  %s252_s8 = scalar_lea.sflag [#allocation5], %s689_s19  ;;  %s522_s15 = sshra.s32 %s265_s7, 4  ;;  %s523_s15 = int_to_ptr.hbm [resolvable:$true] %s522_s15 }
  0x27   : > { %s524_s16 = scalar_lea.hbm %s523_s15, 1  ;;  %s528_s12 = scalar_lea.hbm %s743_s2, 2 }
  0x28   : > { %p525_p4 = scmp.ne.s32.totalorder %s523_s15, %s524_s16  ;;  %p529_p7 = scmp.lt.s32.totalorder %s523_s15, %s743_s2 }
  0x29   : > { %p530_p8 = scmp.lt.s32.totalorder %s528_s12, %s524_s16 }
  0x2a   : > { %p526_p5 = pnand %p525_p4, %p663_p9 }
  0x2b   : > { %v445_v1 = vpop.eup %444  ;;  %p531_p10 = por %p530_p8, %p529_p7 }
  0x2c   : > { %v228_v3 = vmul.f32 0.6931472, %v445_v1  ;;  %vm232_vm0 = vweird.f32 %v445_v1  ;;  %v447_v6 = vpop.eup %446  ;;  %p527_p6 = pneg %p526_p5 }
  0x2d   : > { %v226_v9 = vmul.f32 0.6931472, %v447_v6 }
  0x2e   : > { %v229_v4 = vsub.f32 1.0, %v228_v3  ;;  %p532_p13 = pnand %p531_p10, %p527_p6 }
  0x30   : > { %v230_v5 = vmul.f32 %v445_v1, %v229_v4 }
  0x32   : > { %v231_v7 = vadd.f32 %v445_v1, %v230_v5 }
  0x34   : > { %v233_v10 = vsel %vm232_vm0, %v445_v1, %v231_v7 }
  0x35   : > { %v234_v11 = vmul.f32 %v233_v10, %v226_v9 }
  0x37   : > { %v235_v12 = vmul.f32 %v234_v11, %v223_v8 }
  0x39   : > { %v236_v13 = vsel %vm224_vm1, %v235_v12, 0.0 }
  0x3a   : > { %v244_v14 = vrot.slane %v236_v13, 4 }
  0x3c   : > { %v245_v15 = vadd.f32 %v244_v14, %v236_v13 }
  0x3e   : > { %v246_v16 = vrot.slane %v245_v15, 2 }
  0x40   : > { %v247_v17 = vadd.f32 %v246_v16, %v245_v15 }
  0x42   : > { %v248_v18 = vrot.slane %v247_v17, 1 }
  0x44   : > { %v249_v19 = vadd.f32 %v248_v18, %v247_v17 }
  0x46   : > { %250 = vst [vmem:[%s216_s5] sm:$0x1] %v249_v19 }
  0x47   : > { %535 = shalt.err (!%p532_p13)
}
  0x48   : > { %380 = dma.vmem_to_hbm [thread:$0]  (%p663_p9), %s263_s6, 16, %s265_s7, %s252_s8  }
  0x49 PF: > { %s276_s19 = sand.u32 1, %s574_s9   ;;  %p390_p0 = pnand %p366_p12, %p670_p11 }
  0x4a   : > { %s277_s30 = scalar_lea.sflag [#allocation5], %s276_s19 }
  0x4b   : > { %p391_p1 = pneg %p390_p0 }
  0x4d   : > { %569 = dma.done.wait (%p391_p1), %s277_s30, 16  }
  0x4e   : > { %571 = vsyncadd (%p391_p1), %s277_s30, 4294967280  ;;  %s21_s14 = sadd.s32 1, %s594_s14   ;;  %s748_s9 = smov %s578_s10 }
  0x4f   : > { %p18_p2 = scmp.ge.s32.totalorder %s21_s14, 4   ;;  %s749_s10 = smov %s582_s11 }
  0x50   : > { %s750_s11 = smov %s668_s23  ;;  %s751_s12 = smov %s590_s13 }
  0x51   : > { %s752_s13 = smov %s754_s17  ;;  %20 = sbr.rel (!%p18_p2) target bundleno = 8 (0x8), region = 94 }
  0x56   :  { %282 = vsyncpa [#allocation4], 1 }
  0x57   :  { %284 = vsyncpa [#allocation4 + $0x1], 1 }
  0x58   :  { %285 = vsyncpa [#allocation7], 1 }
  0x59   :  { %287 = vsyncpa [#allocation7 + $0x1], 1 }
  0x5a   :  { %288 = vsyncpa [#allocation5], 1 }
  0x5b   :  { %290 = vsyncpa [#allocation5 + $0x1], 1 }

</bundles_post_ra>
